<compile_context>
chip_gen: v7x
topology: tpu7x:2x2x1
jax: 0.10.0
libtpu: 0.0.40
codegen_flags: <defaults>
</compile_context>

<pallas_src>
import functools

import jax
import jax.numpy as jnp
from jax import lax
from jax.experimental import pallas as pl
from jax.experimental.pallas import tpu as pltpu


def _round_up(v, m):
    return (v + m - 1) // m * m


def _sublane(itemsize):
    # Sublane packing: 8 rows for 4-byte, 16 for 2-byte, 32 for 1-byte dtypes.
    return max(8, 32 // max(itemsize, 1))


def _tpu_vmem_and_cores():
    """Best-effort query of per-core VMEM capacity and TensorCores per chip."""
    vmem_bytes = 128 << 20
    num_cores = 1
    try:
        info = pltpu.get_tpu_info()
        vmem_bytes = int(getattr(info, "vmem_capacity_bytes", vmem_bytes))
        cores = None
        for attr in ("num_cores", "tensorcores_per_chip", "core_count", "num_tensorcores"):
            v = getattr(info, attr, None)
            if v:
                cores = int(v)
                break
        if cores is None:
            # v7x-class parts expose ~64 MiB VMEM per TensorCore and have 2 TCs.
            cores = 2 if vmem_bytes <= (80 << 20) else 1
        num_cores = cores
    except Exception:
        pass
    return vmem_bytes, num_cores


# ----------------------------- single fused pass -----------------------------

def _eca_kernel(x_ref, wt_ref, b_ref, o_ref):
    # x_ref: (tb, C, L)  wt_ref: (C, C) pre-transposed center tap  b_ref: (1, C) f32
    x = x_ref[...]
    # AdaptiveAvgPool1d(1): mean over L, f32 accumulation only (no f32 block copy).
    # NOTE: verify on v6e/v7x bundles that this stays VPU-dominant; pre-accumulate
    # explicitly only if per-vreg XLU reduces show up hot.
    y = jnp.mean(x, axis=-1, dtype=jnp.float32)                         # (tb, C)
    # Conv1d(k, padding=k//2) on a length-1 input collapses to center-tap matmul.
    z = jnp.dot(y, wt_ref[...].astype(jnp.float32),
                preferred_element_type=jnp.float32) + b_ref[...]        # (tb, C)
    s = jax.nn.sigmoid(z).astype(x.dtype)                               # channel gate
    o_ref[...] = (x * s[:, :, None]).astype(o_ref.dtype)


# --------------------- L-split two-pass fallback kernels ----------------------

def _eca_gate_kernel(x_ref, wt_ref, b_ref, g_ref, acc_ref, *, length, chunk, mask_tail):
    j = pl.program_id(1)

    @pl.when(j == 0)
    def _():
        acc_ref[...] = jnp.zeros_like(acc_ref)

    x = x_ref[...]                                                      # (1, C, chunk)
    if mask_tail:
        col = lax.broadcasted_iota(jnp.int32, x.shape, 2) + j * chunk
        x = jnp.where(col < length, x, jnp.zeros_like(x))
    acc_ref[...] += jnp.sum(x, axis=-1, dtype=jnp.float32)              # (1, C)

    @pl.when(j == pl.num_programs(1) - 1)
    def _():
        y = acc_ref[...] * (1.0 / float(length))
        z = jnp.dot(y, wt_ref[...].astype(jnp.float32),
                    preferred_element_type=jnp.float32) + b_ref[...]
        g_ref[...] = jax.nn.sigmoid(z)[:, None, :].astype(g_ref.dtype)  # (1, 1, C)


def _eca_scale_kernel(x_ref, g_ref, o_ref):
    x = x_ref[...]                                                      # (1, C, chunk)
    s = g_ref[...][0].astype(x.dtype)                                   # (1, C)
    o_ref[...] = (x * s[:, :, None]).astype(o_ref.dtype)


def _eca_two_pass(x, w_t, bias2d, *, target_block_bytes, vmem_cap):
    B, C, L = x.shape
    itemsize = jnp.dtype(x.dtype).itemsize
    pad_C = _round_up(C, _sublane(itemsize))
    pad_L = _round_up(L, 128)

    # Largest 128-aligned L-chunk whose (1, C, chunk) block fits the budget.
    # TODO(synk): if even pad_C * 128 * itemsize exceeds VMEM (enormous C), a
    # channel-split would also be needed; not handled here.
    max_chunk = max(1, target_block_bytes // (pad_C * itemsize))
    chunk = int(min(pad_L, max(128, (max_chunk // 128) * 128)))
    n_l = pl.cdiv(L, chunk)
    mask_tail = (L % chunk) != 0

    chunk_bytes = pad_C * chunk * itemsize
    w_itemsize = jnp.dtype(w_t.dtype).itemsize
    w_bytes = _round_up(C, _sublane(w_itemsize)) * _round_up(C, 128) * w_itemsize
    b_bytes = 8 * _round_up(C, 128) * 4
    gate_bytes = 8 * _round_up(C, 128) * 4
    vmem_cap_limit = int(0.75 * vmem_cap)

    # Pass 1: per-(batch, L-chunk) partial sums -> per-batch channel gate.
    v1 = 2 * chunk_bytes + chunk_bytes + 2 * w_bytes + 2 * b_bytes + 4 * gate_bytes
    gate = pl.pallas_call(
        functools.partial(_eca_gate_kernel, length=L, chunk=chunk, mask_tail=mask_tail),
        out_shape=jax.ShapeDtypeStruct((B, 1, C), x.dtype),
        grid=(B, n_l),
        in_specs=[
            pl.BlockSpec((1, C, chunk), lambda i, j: (i, 0, j)),
            pl.BlockSpec((C, C), lambda i, j: (0, 0)),
            pl.BlockSpec((1, C), lambda i, j: (0, 0)),
        ],
        out_specs=pl.BlockSpec((1, 1, C), lambda i, j: (i, 0, 0)),
        scratch_shapes=[pltpu.VMEM((1, C), jnp.float32)],
        compiler_params=pltpu.CompilerParams(
            dimension_semantics=("parallel", "arbitrary"),
            vmem_limit_bytes=int(min(max(int(1.2 * v1), 32 << 20), vmem_cap_limit)),
        ),
    )(x, w_t, bias2d)

    # Pass 2: rescale x by the broadcast gate, streamed in L chunks.
    v2 = 4 * chunk_bytes + chunk_bytes + 2 * gate_bytes
    return pl.pallas_call(
        _eca_scale_kernel,
        out_shape=jax.ShapeDtypeStruct(x.shape, x.dtype),
        grid=(B, n_l),
        in_specs=[
            pl.BlockSpec((1, C, chunk), lambda i, j: (i, 0, j)),
            pl.BlockSpec((1, 1, C), lambda i, j: (i, 0, 0)),
        ],
        out_specs=pl.BlockSpec((1, C, chunk), lambda i, j: (i, 0, j)),
        compiler_params=pltpu.CompilerParams(
            dimension_semantics=("parallel", "parallel"),
            vmem_limit_bytes=int(min(max(int(1.2 * v2), 32 << 20), vmem_cap_limit)),
        ),
    )(x, gate)


# --------------------------------- wrapper ------------------------------------

def eca_forward(x, conv_weight, conv_bias, *, target_block_bytes=None):
    """x: (B, C, L), conv_weight: (C, C, K), conv_bias: (C,)."""
    B, C, L = x.shape
    co, ci, k = conv_weight.shape
    assert co == C and ci == C, "Conv1d must map C -> C channels"
    assert k % 2 == 1, "ECALayer kernel requires odd kernel_size (padding = k // 2)"

    # Center-tap collapse; hoist transpose + dtype cast out of the hot loop.
    w_t = jnp.transpose(conv_weight[:, :, k // 2]).astype(x.dtype)     # (C, C)
    bias2d = conv_bias.reshape(1, C).astype(jnp.float32)               # (1, C)

    vmem_cap, num_cores = _tpu_vmem_and_cores()
    if target_block_bytes is None:
        # Bigger tiles on 128 MiB VMEM parts (v5e/v6e), smaller on 64 MiB/TC (v7x).
        target_block_bytes = (8 << 20) if vmem_cap <= (80 << 20) else (14 << 20)

    itemsize = jnp.dtype(x.dtype).itemsize
    pad_C = _round_up(C, _sublane(itemsize))
    pad_L = _round_up(L, 128)
    padded_row_bytes = pad_C * pad_L * itemsize   # true VMEM cost of one (1, C, L) row

    if padded_row_bytes > target_block_bytes:
        # A single row exceeds the block budget: stream over L (two-pass) instead.
        return _eca_two_pass(x, w_t, bias2d,
                             target_block_bytes=target_block_bytes, vmem_cap=vmem_cap)

    # Single fused pass over batch tiles.
    tb = int(max(1, min(B, target_block_bytes // padded_row_bytes)))
    steps = pl.cdiv(B, tb)
    if num_cores > 1 and B > 1:
        # Guarantee >= num_cores grid steps so both TensorCores get work (v7x).
        steps = max(steps, min(num_cores, B))
    tb = pl.cdiv(B, steps)                     # rebalance to evenly sized blocks
    steps = pl.cdiv(B, tb)

    block_bytes = tb * padded_row_bytes
    w_itemsize = jnp.dtype(w_t.dtype).itemsize
    w_bytes = _round_up(C, _sublane(w_itemsize)) * _round_up(C, 128) * w_itemsize
    b_bytes = 8 * _round_up(C, 128) * 4
    gate_bytes = 4 * _round_up(tb, 8) * _round_up(C, 128) * 4
    vmem_cap_limit = int(0.75 * vmem_cap)

    def run(buffered_consts):
        const_kwargs = {"pipeline_mode": pl.Buffered(1)} if buffered_consts else {}
        w_bufs = 1 if buffered_consts else 2
        # x/out double-buffered + one block of temporaries + resident consts, +20% headroom.
        vmem_needed = 4 * block_bytes + block_bytes + w_bufs * w_bytes + 2 * b_bytes + gate_bytes
        vmem_limit = int(min(max(int(1.2 * vmem_needed), 32 << 20), vmem_cap_limit))
        return pl.pallas_call(
            _eca_kernel,
            out_shape=jax.ShapeDtypeStruct(x.shape, x.dtype),
            grid=(steps,),
            in_specs=[
                pl.BlockSpec((tb, C, L), lambda i: (i, 0, 0)),            # streamed batch tile
                pl.BlockSpec((C, C), lambda i: (0, 0), **const_kwargs),   # resident weight
                pl.BlockSpec((1, C), lambda i: (0, 0), **const_kwargs),   # resident bias
            ],
            out_specs=pl.BlockSpec((tb, C, L), lambda i: (i, 0, 0)),
            compiler_params=pltpu.CompilerParams(
                dimension_semantics=("parallel",),
                vmem_limit_bytes=vmem_limit,
            ),
        )(x, w_t, bias2d)

    try:
        return run(True)
    except Exception:
        # pipeline_mode=pl.Buffered(1) unsupported on this jax version: fall back
        # to default double-buffered constant specs (perf-only difference).
        return run(False)


# -------------------------------- reference -----------------------------------

def eca_reference(x, conv_weight, conv_bias):
    """Pure-JAX reference mirroring the PyTorch forward exactly."""
    y = jnp.mean(x, axis=-1, keepdims=True)                            # (B, C, 1)
    k = conv_weight.shape[-1]
    y_pad = jnp.pad(y, ((0, 0), (0, 0), (k // 2, k // 2)))
    z = jnp.einsum("bck,ock->bo", y_pad, conv_weight) + conv_bias      # (B, C)
    s = jax.nn.sigmoid(z)[:, :, None]
    return x * s


def _make_params(key, C, K):
    kw, kb = jax.random.split(key)
    bound = 1.0 / (C * K) ** 0.5  # PyTorch default Conv1d init bound
    w = jax.random.uniform(kw, (C, C, K), jnp.float32, -bound, bound)
    b = jax.random.uniform(kb, (C,), jnp.float32, -bound, bound)
    return w, b


if __name__ == "__main__":
    key = jax.random.PRNGKey(0)
    k1, k2, k3, k4, k5 = jax.random.split(key, 5)

    # 1) Small single-pass test.
    B, C, L, K = 2, 4, 16, 3
    x = jax.random.normal(k1, (B, C, L), dtype=jnp.float32)
    w, b = _make_params(k2, C, K)
    out = jax.block_until_ready(eca_forward(x, w, b))
    ref = eca_reference(x, w, b)
    assert out.shape == x.shape and out.dtype == x.dtype
    assert jnp.allclose(out, ref, atol=1e-5, rtol=1e-5), "mismatch (small)"

    # 2) Multi-step pipelined batch grid (tb forced to 2 -> 3 grid steps).
    B2, C2, L2 = 6, 8, 128
    x2 = jax.random.normal(k3, (B2, C2, L2), dtype=jnp.float32)
    w2, b2 = _make_params(k2, C2, K)
    out2 = jax.block_until_ready(
        eca_forward(x2, w2, b2, target_block_bytes=2 * C2 * L2 * 4))
    ref2 = eca_reference(x2, w2, b2)
    assert jnp.allclose(out2, ref2, atol=1e-5, rtol=1e-5), "mismatch (batch grid)"

    # 3) L-split two-pass fallback (row bigger than forced budget, ragged L tail mask).
    B3, C3, L3 = 3, 16, 600
    x3 = jax.random.normal(k4, (B3, C3, L3), dtype=jnp.float32)
    w3, b3 = _make_params(k2, C3, K)
    out3 = jax.block_until_ready(eca_forward(x3, w3, b3, target_block_bytes=20_000))
    ref3 = eca_reference(x3, w3, b3)
    assert jnp.allclose(out3, ref3, atol=1e-5, rtol=1e-5), "mismatch (L-split fallback)"

    # 4) bf16 activations (mean accumulated in f32, gate cast back to bf16).
    x4 = jax.random.normal(k5, (4, 8, 256), dtype=jnp.bfloat16)
    w4, b4 = _make_params(k2, 8, K)
    out4 = jax.block_until_ready(eca_forward(x4, w4, b4))
    ref4 = eca_reference(x4.astype(jnp.float32), w4, b4)
    assert out4.dtype == jnp.bfloat16
    assert jnp.allclose(out4.astype(jnp.float32), ref4, atol=5e-2, rtol=5e-2), "mismatch (bf16)"

    print("KERNEL_OK")
</pallas_src>

<mosaic_0001>
module attributes {stable_mosaic.version = 11 : i64} {
  func.func @_eca_kernel(%arg0: i32, %arg1: memref<2x4x16xf32, #tpu.memory_space<vmem>>, %arg2: memref<4x4xf32, #tpu.memory_space<vmem>>, %arg3: memref<1x4xf32, #tpu.memory_space<vmem>>, %arg4: memref<2x4x16xf32, #tpu.memory_space<vmem>>) attributes {dimension_semantics = [#tpu.dimension_semantics<parallel>], iteration_bounds = array<i64: 1>, scalar_prefetch = 0 : i64, scratch_operands = 0 : i64, tpu.core_type = #tpu.core_type<tc>, window_params = [{transform_indices = @transform_0, window_bounds = array<i64: 2, 4, 16>}, {pipeline_mode = #tpu.pipeline_mode<synchronous>, transform_indices = @transform_1, window_bounds = array<i64: 4, 4>}, {pipeline_mode = #tpu.pipeline_mode<synchronous>, transform_indices = @transform_2, window_bounds = array<i64: 1, 4>}, {transform_indices = @transform_3, window_bounds = array<i64: 2, 4, 16>}]} {
    %c0 = arith.constant 0 : index
    %c0_0 = arith.constant 0 : index
    %c0_1 = arith.constant 0 : index
    %0 = vector.load %arg1[%c0, %c0_0, %c0_1] : memref<2x4x16xf32, #tpu.memory_space<vmem>>, vector<2x4x16xf32>
    %cst = arith.constant dense<0.000000e+00> : vector<2x4xf32>
    %1 = vector.multi_reduction <add>, %0, %cst [2] : vector<2x4x16xf32> to vector<2x4xf32>
    %cst_2 = arith.constant 1.600000e+01 : f32
    %2 = vector.broadcast %cst_2 : f32 to vector<2x4xf32>
    %3 = arith.divf %1, %2 : vector<2x4xf32>
    %c0_3 = arith.constant 0 : index
    %c0_4 = arith.constant 0 : index
    %4 = vector.load %arg2[%c0_3, %c0_4] : memref<4x4xf32, #tpu.memory_space<vmem>>, vector<4x4xf32>
    %cst_5 = arith.constant dense<0.000000e+00> : vector<2x4xf32>
    %5 = tpu.matmul %3, %4, %cst_5 {dimension_numbers = #tpu.dot_dimension_numbers<[1], [0], [0], [1], [0, 0, 1, 1], [], []>} : vector<2x4xf32>, vector<4x4xf32>, vector<2x4xf32> -> vector<2x4xf32>
    %c0_6 = arith.constant 0 : index
    %c0_7 = arith.constant 0 : index
    %6 = vector.load %arg3[%c0_6, %c0_7] : memref<1x4xf32, #tpu.memory_space<vmem>>, vector<1x4xf32>
    %7 = vector.broadcast %6 : vector<1x4xf32> to vector<2x4xf32>
    %8 = arith.addf %5, %7 : vector<2x4xf32>
    %9 = arith.negf %8 : vector<2x4xf32>
    %10 = math.exp %9 : vector<2x4xf32>
    %cst_8 = arith.constant 1.000000e+00 : f32
    %11 = vector.broadcast %cst_8 : f32 to vector<2x4xf32>
    %12 = arith.addf %11, %10 : vector<2x4xf32>
    %13 = arith.divf %11, %12 : vector<2x4xf32>
    %14 = vector.shape_cast %13 : vector<2x4xf32> to vector<2x4x1xf32>
    %15 = vector.broadcast %14 : vector<2x4x1xf32> to vector<2x4x16xf32>
    %16 = arith.mulf %0, %15 : vector<2x4x16xf32>
    %c0_9 = arith.constant 0 : index
    %c0_10 = arith.constant 0 : index
    %c0_11 = arith.constant 0 : index
    %17 = vector.load %arg4[%c0_9, %c0_10, %c0_11] : memref<2x4x16xf32, #tpu.memory_space<vmem>>, vector<2x4x16xf32>
    tpu.vector_store %arg4[%c0_9, %c0_10, %c0_11], %16 {strides = array<i32>} : memref<2x4x16xf32, #tpu.memory_space<vmem>>, vector<2x4x16xf32>,
    return
  }
  func.func @transform_0(%arg0: i32) -> (i32, i32, i32) {
    %c0_i32 = arith.constant 0 : i32
    %c0_i32_0 = arith.constant 0 : i32
    %c0_i32_1 = arith.constant 0 : i32
    return %arg0, %c0_i32, %c0_i32_0 : i32, i32, i32
  }
  func.func @transform_1(%arg0: i32) -> (i32, i32) {
    %c0_i32 = arith.constant 0 : i32
    %c0_i32_0 = arith.constant 0 : i32
    %c0_i32_1 = arith.constant 0 : i32
    return %c0_i32, %c0_i32_0 : i32, i32
  }
  func.func @transform_2(%arg0: i32) -> (i32, i32) {
    %c0_i32 = arith.constant 0 : i32
    %c0_i32_0 = arith.constant 0 : i32
    %c0_i32_1 = arith.constant 0 : i32
    return %c0_i32, %c0_i32_0 : i32, i32
  }
  func.func @transform_3(%arg0: i32) -> (i32, i32, i32) {
    %c0_i32 = arith.constant 0 : i32
    %c0_i32_0 = arith.constant 0 : i32
    %c0_i32_1 = arith.constant 0 : i32
    return %arg0, %c0_i32, %c0_i32_0 : i32, i32, i32
  }
}

module attributes {stable_mosaic.version = 11 : i64} {
  func.func @_eca_kernel(%arg0: i32, %arg1: memref<2x4x16xf32, #tpu.memory_space<vmem>>, %arg2: memref<4x4xf32, #tpu.memory_space<vmem>>, %arg3: memref<1x4xf32, #tpu.memory_space<vmem>>, %arg4: memref<2x4x16xf32, #tpu.memory_space<vmem>>) attributes {dimension_semantics = [#tpu.dimension_semantics<parallel>], iteration_bounds = array<i64: 1>, scalar_prefetch = 0 : i64, scratch_operands = 0 : i64, tpu.core_type = #tpu.core_type<tc>, window_params = [{transform_indices = @transform_0, window_bounds = array<i64: 2, 4, 16>}, {pipeline_mode = #tpu.pipeline_mode<synchronous>, transform_indices = @transform_1, window_bounds = array<i64: 4, 4>}, {pipeline_mode = #tpu.pipeline_mode<synchronous>, transform_indices = @transform_2, window_bounds = array<i64: 1, 4>}, {transform_indices = @transform_3, window_bounds = array<i64: 2, 4, 16>}]} {
    %c0 = arith.constant 0 : index
    %c0_0 = arith.constant 0 : index
    %c0_1 = arith.constant 0 : index
    %0 = vector.load %arg1[%c0, %c0_0, %c0_1] : memref<2x4x16xf32, #tpu.memory_space<vmem>>, vector<2x4x16xf32>
    %cst = arith.constant dense<0.000000e+00> : vector<2x4xf32>
    %1 = vector.multi_reduction <add>, %0, %cst [2] : vector<2x4x16xf32> to vector<2x4xf32>
    %cst_2 = arith.constant 1.600000e+01 : f32
    %2 = vector.broadcast %cst_2 : f32 to vector<2x4xf32>
    %3 = arith.divf %1, %2 : vector<2x4xf32>
    %c0_3 = arith.constant 0 : index
    %c0_4 = arith.constant 0 : index
    %4 = vector.load %arg2[%c0_3, %c0_4] : memref<4x4xf32, #tpu.memory_space<vmem>>, vector<4x4xf32>
    %cst_5 = arith.constant dense<0.000000e+00> : vector<2x4xf32>
    %5 = tpu.matmul %3, %4, %cst_5 {dimension_numbers = #tpu.dot_dimension_numbers<[1], [0], [0], [1], [0, 0, 1, 1], [], []>} : vector<2x4xf32>, vector<4x4xf32>, vector<2x4xf32> -> vector<2x4xf32>
    %c0_6 = arith.constant 0 : index
    %c0_7 = arith.constant 0 : index
    %6 = vector.load %arg3[%c0_6, %c0_7] : memref<1x4xf32, #tpu.memory_space<vmem>>, vector<1x4xf32>
    %7 = vector.broadcast %6 : vector<1x4xf32> to vector<2x4xf32>
    %8 = arith.addf %5, %7 : vector<2x4xf32>
    %9 = arith.negf %8 : vector<2x4xf32>
    %10 = math.exp %9 : vector<2x4xf32>
    %cst_8 = arith.constant 1.000000e+00 : f32
    %11 = vector.broadcast %cst_8 : f32 to vector<2x4xf32>
    %12 = arith.addf %11, %10 : vector<2x4xf32>
    %13 = arith.divf %11, %12 : vector<2x4xf32>
    %14 = vector.shape_cast %13 : vector<2x4xf32> to vector<2x4x1xf32>
    %15 = vector.broadcast %14 : vector<2x4x1xf32> to vector<2x4x16xf32>
    %16 = arith.mulf %0, %15 : vector<2x4x16xf32>
    %c0_9 = arith.constant 0 : index
    %c0_10 = arith.constant 0 : index
    %c0_11 = arith.constant 0 : index
    %17 = vector.load %arg4[%c0_9, %c0_10, %c0_11] : memref<2x4x16xf32, #tpu.memory_space<vmem>>, vector<2x4x16xf32>
    tpu.vector_store %arg4[%c0_9, %c0_10, %c0_11], %16 {strides = array<i32>} : memref<2x4x16xf32, #tpu.memory_space<vmem>>, vector<2x4x16xf32>,
    return
  }
  func.func @transform_0(%arg0: i32) -> (i32, i32, i32) {
    %c0_i32 = arith.constant 0 : i32
    %c0_i32_0 = arith.constant 0 : i32
    %c0_i32_1 = arith.constant 0 : i32
    return %arg0, %c0_i32, %c0_i32_0 : i32, i32, i32
  }
  func.func @transform_1(%arg0: i32) -> (i32, i32) {
    %c0_i32 = arith.constant 0 : i32
    %c0_i32_0 = arith.constant 0 : i32
    %c0_i32_1 = arith.constant 0 : i32
    return %c0_i32, %c0_i32_0 : i32, i32
  }
  func.func @transform_2(%arg0: i32) -> (i32, i32) {
    %c0_i32 = arith.constant 0 : i32
    %c0_i32_0 = arith.constant 0 : i32
    %c0_i32_1 = arith.constant 0 : i32
    return %c0_i32, %c0_i32_0 : i32, i32
  }
  func.func @transform_3(%arg0: i32) -> (i32, i32, i32) {
    %c0_i32 = arith.constant 0 : i32
    %c0_i32_0 = arith.constant 0 : i32
    %c0_i32_1 = arith.constant 0 : i32
    return %arg0, %c0_i32, %c0_i32_0 : i32, i32, i32
  }
}

</mosaic_0001>

<bundles_post_ra>
// kernel: tpu_custom_call.1
= control target key start
LH: loop header
LB: loop body
LE: loop exit
PB: predicated region body
PF: predicated region fallthrough
CT: control target
= control target key end

     0   :  { %8 = vsyncpa [#allocation3], 0  ;;  %s364_s0 = inlined_call_operand.hbm [shape: f32[2,4,16], index: 0, kind: input, shape index: {}]   ;;  %s365_s1 = inlined_call_operand.hbm [shape: f32[4,4], index: 1, kind: input, shape index: {}]   ;;  %s366_s2 = inlined_call_operand.vmem [shape: f32[1,4], index: 2, kind: input, shape index: {}]   ;;  %s367_s3 = inlined_call_operand.hbm [shape: f32[2,4,16], index: 3, kind: output, shape index: {}]  }
   0x1   :  { %9 = vsyncpa [#allocation6], 0 }
   0x2   :  { %10 = vsyncpa [#allocation4], 0  ;;  %s288_s12 = smov [#allocation2]   ;;  %s216_s16 = scalar_lea.hbm %s364_s0, 128 }
   0x3   :  { %s16_s13 = sshll.u32 %s288_s12, 4  ;;  %p217_p0 = scmp.ne.s32.totalorder %s364_s0, %s216_s16  ;;  %s17_s13 = int_to_ptr.vmem [resolvable:$true] %s16_s13 }
   0x4   :  { %p220_p1 = scmp.lt.u32.totalorder %s216_s16, %s364_s0 }
   0x6   :  { %p222_p2 = pnand %p220_p1, %p217_p0 }
   0x8   :  { %225 = shalt.err (!%p222_p2)
}
   0x9   :  { %s226_s21 = scalar_lea.vmem %s17_s13, 128  ;;  %p231_p4 = scmp.lt.s32.totalorder %s17_s13, %s17_s13 }
   0xa   :  { %p227_p3 = scmp.ne.s32.totalorder %s17_s13, %s226_s21  ;;  %p232_p5 = scmp.lt.s32.totalorder %s226_s21, %s226_s21 }
   0xc   :  { %p233_p6 = por %p232_p5, %p231_p4 }
   0xe   :  { %p234_p7 = pnand %p233_p6, %p227_p3 }
  0x10   :  { %237 = shalt.err (!%p234_p7)
}
  0x11   :  { %s289_s22 = smov 64   ;;  %s290_s23 = smov 4  }
  0x12   :  { %22 = dma.hbm_to_vmem [thread:$0]  %s364_s0, 128, %s17_s13, [#allocation3], %s289_s22, %s289_s22, %s290_s23  }
  0x13   :  { %s291_s26 = smov [#allocation5]   ;;  %s238_s30 = scalar_lea.hbm %s365_s1, 64 }
  0x14   :  { %s29_s27 = sshll.u32 %s291_s26, 4  ;;  %p239_p8 = scmp.ne.s32.totalorder %s365_s1, %s238_s30  ;;  %s30_s27 = int_to_ptr.vmem [resolvable:$true] %s29_s27 }
  0x15   :  { %p242_p9 = scmp.lt.u32.totalorder %s238_s30, %s365_s1 }
  0x17   :  { %p244_p10 = pnand %p242_p9, %p239_p8 }
  0x19   :  { %247 = shalt.err (!%p244_p10)
}
  0x1a   :  { %s248_s8 = scalar_lea.vmem %s30_s27, 64  ;;  %p253_p12 = scmp.lt.s32.totalorder %s30_s27, %s30_s27 }
  0x1b   :  { %p249_p11 = scmp.ne.s32.totalorder %s30_s27, %s248_s8  ;;  %p254_p13 = scmp.lt.s32.totalorder %s248_s8, %s248_s8 }
  0x1d   :  { %p255_p0 = por %p254_p13, %p253_p12 }
  0x1f   :  { %p256_p1 = pnand %p255_p0, %p249_p11 }
  0x21   :  { %259 = shalt.err (!%p256_p1)
}
  0x22   :  { %32 = dma.hbm_to_vmem [thread:$0]  %s365_s1, 64, %s30_s27, [#allocation6]  }
  0x23   :  { %282 = dma.done.wait [#allocation3], 128  }
  0x24   :  { %283 = vsyncadd [#allocation3], 4294967168 }
  0x25   :  { %284 = dma.done.wait [#allocation6], 64  }
  0x26   :  { %285 = vsyncadd [#allocation6], 4294967232  ;;  %vm43_vm0 = vcmask 125952   ;;  %v41_v0 = vld [vmem:[#allocation2] sm:$0xf]  ;;  %vm78_vm1 = vcmask 1043456   ;;  %v63_v6 = vlaneseq }
  0x27   :  { %v42_v1 = vld [vmem:[#allocation2 + $0x4] sm:$0xf]  ;;  %v44_v2 = vsel %vm43_vm0, %v41_v0, 0.0  ;;  %v53_v4 = vld [vmem:[#allocation5] sm:$0xf]  ;;  %v292_v5 = vmov 0.0  }
  0x28   :  { %45 = vadd.xlane.f32.xlu0 %v44_v2  ;;  %v47_v3 = vsel %vm43_vm0, %v42_v1, 0.0  ;;  %200 = vmatprep.subr.mxu0 %v292_v5  ;;  %vm293_vm2 = vmmov 0   ;;  %v64_v7 = vand.u32 127, %v63_v6  ;;  %v66_v8 = vshrl.u32 %v63_v6, 7  ;;  %v194_v17 = vld [vmem:[%s366_s2] ss:$0 sm:$0xff] }
  0x29   :  { %202 = vmatprep.mubr.msk.f32.mxu0 %vm293_vm2, %v292_v5  ;;  %201 = vmatpush3.msk.msra.mxu0 %vm78_vm1, %v53_v4  ;;  %vm73_vm3 = vcmask 1041409   ;;  %vm75_vm4 = vcmask 31744   ;;  %s294_s11 = smov [#allocation7]  }
  0x2a   :  { %v67_v10 = vsub.s32 %v64_v7, %v66_v8  ;;  %v160_v24 = vsub.s32 0, %v66_v8  ;;  %v167_v27 = vsub.s32 1, %v66_v8  ;;  %s181_s12 = sshll.u32 %s294_s11, 4  ;;  %s182_s12 = int_to_ptr.vmem [resolvable:$true] %s181_s12 }
  0x2b   :  { %s260_s2 = scalar_lea.vmem %s182_s12, 128  ;;  %p265_p3 = scmp.lt.s32.totalorder %s182_s12, %s182_s12 }
  0x2c   :  { %48 = vadd.xlane.f32.xlu0 %v47_v3  ;;  %p261_p2 = scmp.ne.s32.totalorder %s182_s12, %s260_s2  ;;  %p266_p4 = scmp.lt.s32.totalorder %s260_s2, %s260_s2 }
  0x2e   :  { %p267_p5 = por %p266_p4, %p265_p3 }
  0x30   :  { %p268_p6 = pnand %p267_p5, %p261_p2 }
  0xb5   :  { %v46_v9 = vpop.xlane.xlu0 %45 }
  0xb6   :  { %v51_v11 = vmul.f32 0.0625, %v46_v9 }
  0xb8   :  { %v68_v14 = vrot.slane %v51_v11, %v67_v10 }
  0xb9   :  { %v49_v12 = vpop.xlane.xlu0 %48 }
  0xba   :  { %v52_v13 = vmul.f32 0.0625, %v49_v12 }
  0xbc   :  { %v72_v15 = vrot.slane %v52_v13, %v67_v10 }
  0xbe   :  { %v74_v16 = vsel %vm73_vm3, %v72_v15, %v68_v14 }
  0xbf   :  { %203 = vmatmul.mubr.msk.f32.vlgmr.msra.gmra.mrb[0].mxu0 %vm75_vm4, %v74_v16 }
 0x192   :  { %v148_v18 = vpop.f32.mrb[0].mxu0 }
 0x193   :  { %v149_v19 = vadd.f32 %v194_v17, %v148_v18  ;;  %v204_v20 = vpop.f32.mrb[1].mxu0 }
 0x195   :  { %v197_v21 = vmul.f32 -1.442695, %v149_v19 }
 0x197   :  { %212 = vpow2.f32 %v197_v21 }
 0x1a1   :  { %v213_v22 = vpop.eup %212 }
 0x1a2   :  { %v155_v23 = vadd.f32 1.0, %v213_v22 }
 0x1a4   :  { %214 = vrcp.f32 %v155_v23 }
 0x1ae   :  { %v215_v25 = vpop.eup %214 }
 0x1af   :  { %v161_v26 = vrot.slane %v215_v25, %v160_v24  ;;  %v168_v28 = vrot.slane %v215_v25, %v167_v27 }
 0x1b1   :  { %163 = vbcast.lane.b32.xlu1 %v161_v26, 256 }
 0x1b5   :  { %170 = vbcast.lane.b32.xlu1 %v168_v28, 256 }
 0x223   :  { %v164_v29 = vpop.permute.xlu1 %163 }
 0x224   :  { %v172_v30 = vmul.f32 %v164_v29, %v41_v0 }
 0x226   :  { %174 = vst.msk [vmem:[#allocation7] sm:$0xf] %vm43_vm0, %v172_v30 }
 0x227   :  { %v171_v31 = vpop.permute.xlu1 %170 }
 0x228   :  { %v173_v32 = vmul.f32 %v171_v31, %v42_v1 }
 0x22a   :  { %175 = vst.msk [vmem:[#allocation7 + $0x4] sm:$0xf] %vm43_vm0, %v173_v32 }
 0x22b   :  { %271 = shalt.err (!%p268_p6)
}
 0x22c   :  { %s272_s15 = scalar_lea.hbm %s367_s3, 128 }
 0x22d   :  { %p273_p7 = scmp.ne.s32.totalorder %s367_s3, %s272_s15  ;;  %p276_p8 = scmp.lt.u32.totalorder %s272_s15, %s367_s3 }
 0x22f   :  { %p278_p9 = pnand %p276_p8, %p273_p7 }
 0x231   :  { %281 = shalt.err (!%p278_p9)
}
 0x232   :  { %187 = dma.vmem_to_hbm [thread:$0]  %s182_s12, 128, %s367_s3, [#allocation4], %s289_s22, %s289_s22, %s290_s23  }
 0x233   :  { %286 = dma.done.wait [#allocation4], 128  }
 0x234   :  { %287 = vsyncadd [#allocation4], 4294967168 }
 0x235   :  { %191 = vsyncpa [#allocation3], 1 }
 0x236   :  { %192 = vsyncpa [#allocation6], 1 }
 0x237   :  { %193 = vsyncpa [#allocation4], 1 }

// kernel: tpu_custom_call.1
= control target key start
LH: loop header
LB: loop body
LE: loop exit
PB: predicated region body
PF: predicated region fallthrough
CT: control target
= control target key end

     0   :  { %8 = vsyncpa [#allocation3], 0  ;;  %s364_s0 = inlined_call_operand.hbm [shape: f32[2,4,16], index: 0, kind: input, shape index: {}]   ;;  %s365_s1 = inlined_call_operand.hbm [shape: f32[4,4], index: 1, kind: input, shape index: {}]   ;;  %s366_s2 = inlined_call_operand.vmem [shape: f32[1,4], index: 2, kind: input, shape index: {}]   ;;  %s367_s3 = inlined_call_operand.hbm [shape: f32[2,4,16], index: 3, kind: output, shape index: {}]  }
   0x1   :  { %9 = vsyncpa [#allocation6], 0 }
   0x2   :  { %10 = vsyncpa [#allocation4], 0  ;;  %s288_s12 = smov [#allocation2]   ;;  %s216_s16 = scalar_lea.hbm %s364_s0, 128 }
   0x3   :  { %s16_s13 = sshll.u32 %s288_s12, 4  ;;  %p217_p0 = scmp.ne.s32.totalorder %s364_s0, %s216_s16  ;;  %s17_s13 = int_to_ptr.vmem [resolvable:$true] %s16_s13 }
   0x4   :  { %p220_p1 = scmp.lt.u32.totalorder %s216_s16, %s364_s0 }
   0x6   :  { %p222_p2 = pnand %p220_p1, %p217_p0 }
   0x8   :  { %225 = shalt.err (!%p222_p2)
}
   0x9   :  { %s226_s21 = scalar_lea.vmem %s17_s13, 128  ;;  %p231_p4 = scmp.lt.s32.totalorder %s17_s13, %s17_s13 }
   0xa   :  { %p227_p3 = scmp.ne.s32.totalorder %s17_s13, %s226_s21  ;;  %p232_p5 = scmp.lt.s32.totalorder %s226_s21, %s226_s21 }
   0xc   :  { %p233_p6 = por %p232_p5, %p231_p4 }
   0xe   :  { %p234_p7 = pnand %p233_p6, %p227_p3 }
  0x10   :  { %237 = shalt.err (!%p234_p7)
}
  0x11   :  { %s289_s22 = smov 64   ;;  %s290_s23 = smov 4  }
  0x12   :  { %22 = dma.hbm_to_vmem [thread:$0]  %s364_s0, 128, %s17_s13, [#allocation3], %s289_s22, %s289_s22, %s290_s23  }
  0x13   :  { %s291_s26 = smov [#allocation5]   ;;  %s238_s30 = scalar_lea.hbm %s365_s1, 64 }
  0x14   :  { %s29_s27 = sshll.u32 %s291_s26, 4  ;;  %p239_p8 = scmp.ne.s32.totalorder %s365_s1, %s238_s30  ;;  %s30_s27 = int_to_ptr.vmem [resolvable:$true] %s29_s27 }
  0x15   :  { %p242_p9 = scmp.lt.u32.totalorder %s238_s30, %s365_s1 }
  0x17   :  { %p244_p10 = pnand %p242_p9, %p239_p8 }
  0x19   :  { %247 = shalt.err (!%p244_p10)
}
  0x1a   :  { %s248_s8 = scalar_lea.vmem %s30_s27, 64  ;;  %p253_p12 = scmp.lt.s32.totalorder %s30_s27, %s30_s27 }
  0x1b   :  { %p249_p11 = scmp.ne.s32.totalorder %s30_s27, %s248_s8  ;;  %p254_p13 = scmp.lt.s32.totalorder %s248_s8, %s248_s8 }
  0x1d   :  { %p255_p0 = por %p254_p13, %p253_p12 }
  0x1f   :  { %p256_p1 = pnand %p255_p0, %p249_p11 }
  0x21   :  { %259 = shalt.err (!%p256_p1)
}
  0x22   :  { %32 = dma.hbm_to_vmem [thread:$0]  %s365_s1, 64, %s30_s27, [#allocation6]  }
  0x23   :  { %282 = dma.done.wait [#allocation3], 128  }
  0x24   :  { %283 = vsyncadd [#allocation3], 4294967168 }
  0x25   :  { %284 = dma.done.wait [#allocation6], 64  }
  0x26   :  { %285 = vsyncadd [#allocation6], 4294967232  ;;  %vm43_vm0 = vcmask 125952   ;;  %v41_v0 = vld [vmem:[#allocation2] sm:$0xf]  ;;  %vm78_vm1 = vcmask 1043456   ;;  %v63_v6 = vlaneseq }
  0x27   :  { %v42_v1 = vld [vmem:[#allocation2 + $0x4] sm:$0xf]  ;;  %v44_v2 = vsel %vm43_vm0, %v41_v0, 0.0  ;;  %v53_v4 = vld [vmem:[#allocation5] sm:$0xf]  ;;  %v292_v5 = vmov 0.0  }
  0x28   :  { %45 = vadd.xlane.f32.xlu0 %v44_v2  ;;  %v47_v3 = vsel %vm43_vm0, %v42_v1, 0.0  ;;  %200 = vmatprep.subr.mxu0 %v292_v5  ;;  %vm293_vm2 = vmmov 0   ;;  %v64_v7 = vand.u32 127, %v63_v6  ;;  %v66_v8 = vshrl.u32 %v63_v6, 7  ;;  %v194_v17 = vld [vmem:[%s366_s2] ss:$0 sm:$0xff] }
  0x29   :  { %202 = vmatprep.mubr.msk.f32.mxu0 %vm293_vm2, %v292_v5  ;;  %201 = vmatpush3.msk.msra.mxu0 %vm78_vm1, %v53_v4  ;;  %vm73_vm3 = vcmask 1041409   ;;  %vm75_vm4 = vcmask 31744   ;;  %s294_s11 = smov [#allocation7]  }
  0x2a   :  { %v67_v10 = vsub.s32 %v64_v7, %v66_v8  ;;  %v160_v24 = vsub.s32 0, %v66_v8  ;;  %v167_v27 = vsub.s32 1, %v66_v8  ;;  %s181_s12 = sshll.u32 %s294_s11, 4  ;;  %s182_s12 = int_to_ptr.vmem [resolvable:$true] %s181_s12 }
  0x2b   :  { %s260_s2 = scalar_lea.vmem %s182_s12, 128  ;;  %p265_p3 = scmp.lt.s32.totalorder %s182_s12, %s182_s12 }
  0x2c   :  { %48 = vadd.xlane.f32.xlu0 %v47_v3  ;;  %p261_p2 = scmp.ne.s32.totalorder %s182_s12, %s260_s2  ;;  %p266_p4 = scmp.lt.s32.totalorder %s260_s2, %s260_s2 }
  0x2e   :  { %p267_p5 = por %p266_p4, %p265_p3 }
  0x30   :  { %p268_p6 = pnand %p267_p5, %p261_p2 }
  0xb5   :  { %v46_v9 = vpop.xlane.xlu0 %45 }
  0xb6   :  { %v51_v11 = vmul.f32 0.0625, %v46_v9 }
  0xb8   :  { %v68_v14 = vrot.slane %v51_v11, %v67_v10 }
  0xb9   :  { %v49_v12 = vpop.xlane.xlu0 %48 }
  0xba   :  { %v52_v13 = vmul.f32 0.0625, %v49_v12 }
  0xbc   :  { %v72_v15 = vrot.slane %v52_v13, %v67_v10 }
  0xbe   :  { %v74_v16 = vsel %vm73_vm3, %v72_v15, %v68_v14 }
  0xbf   :  { %203 = vmatmul.mubr.msk.f32.vlgmr.msra.gmra.mrb[0].mxu0 %vm75_vm4, %v74_v16 }
 0x192   :  { %v148_v18 = vpop.f32.mrb[0].mxu0 }
 0x193   :  { %v149_v19 = vadd.f32 %v194_v17, %v148_v18  ;;  %v204_v20 = vpop.f32.mrb[1].mxu0 }
 0x195   :  { %v197_v21 = vmul.f32 -1.442695, %v149_v19 }
 0x197   :  { %212 = vpow2.f32 %v197_v21 }
 0x1a1   :  { %v213_v22 = vpop.eup %212 }
 0x1a2   :  { %v155_v23 = vadd.f32 1.0, %v213_v22 }
 0x1a4   :  { %214 = vrcp.f32 %v155_v23 }
 0x1ae   :  { %v215_v25 = vpop.eup %214 }
 0x1af   :  { %v161_v26 = vrot.slane %v215_v25, %v160_v24  ;;  %v168_v28 = vrot.slane %v215_v25, %v167_v27 }
 0x1b1   :  { %163 = vbcast.lane.b32.xlu1 %v161_v26, 256 }
 0x1b5   :  { %170 = vbcast.lane.b32.xlu1 %v168_v28, 256 }
 0x223   :  { %v164_v29 = vpop.permute.xlu1 %163 }
 0x224   :  { %v172_v30 = vmul.f32 %v164_v29, %v41_v0 }
 0x226   :  { %174 = vst.msk [vmem:[#allocation7] sm:$0xf] %vm43_vm0, %v172_v30 }
 0x227   :  { %v171_v31 = vpop.permute.xlu1 %170 }
 0x228   :  { %v173_v32 = vmul.f32 %v171_v31, %v42_v1 }
 0x22a   :  { %175 = vst.msk [vmem:[#allocation7 + $0x4] sm:$0xf] %vm43_vm0, %v173_v32 }
 0x22b   :  { %271 = shalt.err (!%p268_p6)
}
 0x22c   :  { %s272_s15 = scalar_lea.hbm %s367_s3, 128 }
 0x22d   :  { %p273_p7 = scmp.ne.s32.totalorder %s367_s3, %s272_s15  ;;  %p276_p8 = scmp.lt.u32.totalorder %s272_s15, %s367_s3 }
 0x22f   :  { %p278_p9 = pnand %p276_p8, %p273_p7 }
 0x231   :  { %281 = shalt.err (!%p278_p9)
}
 0x232   :  { %187 = dma.vmem_to_hbm [thread:$0]  %s182_s12, 128, %s367_s3, [#allocation4], %s289_s22, %s289_s22, %s290_s23  }
 0x233   :  { %286 = dma.done.wait [#allocation4], 128  }
 0x234   :  { %287 = vsyncadd [#allocation4], 4294967168 }
 0x235   :  { %191 = vsyncpa [#allocation3], 1 }
 0x236   :  { %192 = vsyncpa [#allocation6], 1 }
 0x237   :  { %193 = vsyncpa [#allocation4], 1 }

</bundles_post_ra>
